<compile_context>
chip_gen: v5e
topology: v5e:2x2
jax: 0.10.0
libtpu: 0.0.40
codegen_flags: <defaults>
</compile_context>

<pallas_src>
import functools

import jax
import jax.numpy as jnp
from jax import lax
from jax.experimental import pallas as pl
from jax.experimental.pallas import tpu as pltpu

OUT = 6     # output features
KIN = 5     # input features of the folded affine map
LANE = 128


def _round_up(n, m):
    return (n + m - 1) // m * m


def _affine_z(w_ref, b_ref, x):
    """Folded affine map z = W_f @ x + b_f as unrolled VPU broadcast-FMAs.

    w_ref: (OUT, KIN), b_ref: (OUT, 1), x: (KIN, TB)  ->  (OUT, TB) float32.
    The 6x5 contraction is far too small to benefit from the MXU on v5e/v6e.
    """
    w = w_ref[...]
    z = b_ref[...] + w[:, 0:1] * x[0:1, :]
    for k in range(1, KIN):
        z = z + w[:, k:k + 1] * x[k:k + 1, :]
    return z


def _lse_kernel(w_ref, b_ref, x_ref, lse_ref, m_sc, l_sc, *, batch, tile):
    """Pass 1: online (m, l) logsumexp over the batch (lane) axis, across tiles."""
    i = pl.program_id(0)

    @pl.when(i == 0)
    def _():
        m_sc[...] = jnp.full_like(m_sc, -jnp.inf)
        l_sc[...] = jnp.zeros_like(l_sc)

    z = _affine_z(w_ref, b_ref, x_ref[...])                       # (OUT, TB)
    # Mask lane-padding columns (batch padded up to a multiple of the tile).
    col = i * tile + lax.broadcasted_iota(jnp.int32, z.shape, 1)
    z = jnp.where(col < batch, z, -jnp.inf)

    m_tile = jnp.max(z, axis=1, keepdims=True)                    # (OUT, 1)
    m_new = jnp.maximum(m_sc[...], m_tile)
    l_sc[...] = (l_sc[...] * jnp.exp(m_sc[...] - m_new)
                 + jnp.sum(jnp.exp(z - m_new), axis=1, keepdims=True))
    m_sc[...] = m_new

    @pl.when(i == pl.num_programs(0) - 1)
    def _():
        lse_ref[...] = m_sc[...] + jnp.log(l_sc[...])


def _normalize_kernel(w_ref, b_ref, lse_ref, x_ref, o_ref):
    """Pass 2: recompute z and write the normalized log-probabilities."""
    z = _affine_z(w_ref, b_ref, x_ref[...])                       # (OUT, TB)
    o_ref[...] = z - lse_ref[...]


def wm_private_forward(x, params, *, tile=8192, feature_major=False):
    """x: (B, 5) float32. params in PyTorch layout: W_k (out, in), b_k (out,)."""
    w1, b1, w2, b2, w3, b3 = params

    # Fold the activation-free Linear chain into one affine map (done once, in XLA).
    wf = (w3 @ w2 @ w1).astype(jnp.float32)                       # (6, 5)
    bf = (w3 @ (w2 @ b1 + b2) + b3).astype(jnp.float32)[:, None]  # (6, 1)

    B = x.shape[0]
    tb = tile if B >= tile else _round_up(B, LANE)                # lane tile (mult of 128)
    Bp = _round_up(B, tb)                                         # padded batch
    nb = Bp // tb                                                 # grid size

    # Feature-major (batch on lanes); pad the batch up to the tile multiple.
    x_fm = x.T.astype(jnp.float32)                                # (5, B)
    if Bp != B:
        x_fm = jnp.pad(x_fm, ((0, 0), (0, Bp - B)))

    # Tiny resident operands: constant index_maps keep them in VMEM across the grid.
    w_spec = pl.BlockSpec((OUT, KIN), lambda i: (0, 0))
    b_spec = pl.BlockSpec((OUT, 1), lambda i: (0, 0))
    lse_spec = pl.BlockSpec((OUT, 1), lambda i: (0, 0))
    x_spec = pl.BlockSpec((KIN, tb), lambda i: (0, i))
    o_spec = pl.BlockSpec((OUT, tb), lambda i: (0, i))

    # ---- pass 1: global logsumexp over the batch (sequential online combine) ----
    lse = pl.pallas_call(
        functools.partial(_lse_kernel, batch=B, tile=tb),
        out_shape=jax.ShapeDtypeStruct((OUT, 1), jnp.float32),
        grid_spec=pltpu.PrefetchScalarGridSpec(
            num_scalar_prefetch=0,
            grid=(nb,),
            in_specs=[w_spec, b_spec, x_spec],
            out_specs=pl.BlockSpec((OUT, 1), lambda i: (0, 0)),
            scratch_shapes=[pltpu.VMEM((OUT, 1), jnp.float32),    # m
                            pltpu.VMEM((OUT, 1), jnp.float32)]),  # l
        compiler_params=pltpu.CompilerParams(
            dimension_semantics=("arbitrary",)),
        cost_estimate=pl.CostEstimate(
            flops=2 * OUT * KIN * Bp + 5 * OUT * Bp,
            transcendentals=OUT * Bp + 2 * OUT * nb,
            bytes_accessed=4 * (KIN * Bp + OUT * KIN + 2 * OUT)),
    )(wf, bf, x_fm)

    # ---- pass 2: recompute z and normalize (independent tiles -> megacore) ----
    out_fm = pl.pallas_call(
        _normalize_kernel,
        out_shape=jax.ShapeDtypeStruct((OUT, Bp), jnp.float32),
        grid_spec=pltpu.PrefetchScalarGridSpec(
            num_scalar_prefetch=0,
            grid=(nb,),
            in_specs=[w_spec, b_spec, lse_spec, x_spec],
            out_specs=o_spec),
        compiler_params=pltpu.CompilerParams(
            dimension_semantics=("parallel",)),
        cost_estimate=pl.CostEstimate(
            flops=2 * OUT * KIN * Bp + OUT * Bp,
            transcendentals=0,
            bytes_accessed=4 * (KIN * Bp + OUT * Bp + OUT * KIN + 2 * OUT)),
    )(wf, bf, lse, x_fm)

    out_fm = out_fm[:, :B]                                        # drop lane padding
    if feature_major:
        return out_fm                                             # (6, B): no extra HBM pass
    # Wrapper-side transpose back to the PyTorch (B, 6) layout; under jit this is
    # layout plumbing that fuses into the consumer (kept out of the kernel so the
    # kernel's stores stay lane-dense).
    return out_fm.T


def init_params(key):
    """PyTorch nn.Linear default init (uniform +/- 1/sqrt(fan_in)), PyTorch layout."""
    dims = [(5, 10), (10, 20), (20, 6)]
    params = []
    for fan_in, fan_out in dims:
        key, kw, kb = jax.random.split(key, 3)
        bound = 1.0 / (fan_in ** 0.5)
        w = jax.random.uniform(kw, (fan_out, fan_in), jnp.float32, -bound, bound)
        b = jax.random.uniform(kb, (fan_out,), jnp.float32, -bound, bound)
        params += [w, b]
    return tuple(params)


def reference_forward(x, params):
    """Plain-JAX reference matching the PyTorch module layer-by-layer."""
    w1, b1, w2, b2, w3, b3 = params
    z = x @ w1.T + b1
    z = z @ w2.T + b2
    z = z @ w3.T + b3
    return jax.nn.log_softmax(z, axis=0)


if __name__ == "__main__":
    key = jax.random.PRNGKey(0)
    k_x, k_x2, k_p = jax.random.split(key, 3)
    params = init_params(k_p)

    forward = jax.jit(wm_private_forward, static_argnames=("tile", "feature_major"))

    # Small shape consistent with the module (input feature dim is fixed at 5).
    B = 8
    x = jax.random.normal(k_x, (B, 5), dtype=jnp.float32)
    out = jax.block_until_ready(forward(x, params))
    ref = reference_forward(x, params)
    assert out.shape == (B, 6)
    assert jnp.allclose(out, ref, atol=1e-4, rtol=1e-4), float(jnp.max(jnp.abs(out - ref)))

    # Exercise the multi-tile grid + lane-padding mask (tile=128 -> 3 tiles, ragged last).
    B2 = 300
    x2 = jax.random.normal(k_x2, (B2, 5), dtype=jnp.float32)
    out2 = jax.block_until_ready(forward(x2, params, tile=128))
    ref2 = reference_forward(x2, params)
    assert out2.shape == (B2, 6)
    assert jnp.allclose(out2, ref2, atol=1e-4, rtol=1e-4), float(jnp.max(jnp.abs(out2 - ref2)))

    print("KERNEL_OK")
</pallas_src>

<mosaic_0001>
module attributes {stable_mosaic.version = 11 : i64} {
  func.func @_lse_kernel(%arg0: i32, %arg1: memref<6x5xf32, #tpu.memory_space<vmem>>, %arg2: memref<6x1xf32, #tpu.memory_space<vmem>>, %arg3: memref<5x128xf32, #tpu.memory_space<vmem>>, %arg4: memref<6x1xf32, #tpu.memory_space<vmem>>, %arg5: memref<6x1xf32, #tpu.memory_space<vmem>>, %arg6: memref<6x1xf32, #tpu.memory_space<vmem>>) attributes {dimension_semantics = [#tpu.dimension_semantics<arbitrary>], iteration_bounds = array<i64: 1>, scalar_prefetch = 0 : i64, scratch_operands = 2 : i64, tpu.core_type = #tpu.core_type<tc>, window_params = [{pipeline_mode = #tpu.pipeline_mode<synchronous>, transform_indices = @transform_0, window_bounds = array<i64: 6, 5>}, {pipeline_mode = #tpu.pipeline_mode<synchronous>, transform_indices = @transform_1, window_bounds = array<i64: 6, 1>}, {transform_indices = @transform_2, window_bounds = array<i64: 5, 128>}, {pipeline_mode = #tpu.pipeline_mode<synchronous>, transform_indices = @transform_3, window_bounds = array<i64: 6, 1>}]} {
    %c0_i32 = arith.constant 0 : i32
    %0 = arith.cmpi eq, %arg0, %c0_i32 : i32
    %1 = arith.extui %0 : i1 to i32
    %c0_i32_0 = arith.constant 0 : i32
    %2 = arith.cmpi ne, %1, %c0_i32_0 : i32
    scf.if %2 {
      %cst_20 = arith.constant 0xFF800000 : f32
      %65 = vector.broadcast %cst_20 : f32 to vector<6x1xf32>
      %c0_21 = arith.constant 0 : index
      %c0_22 = arith.constant 0 : index
      %66 = vector.load %arg5[%c0_21, %c0_22] : memref<6x1xf32, #tpu.memory_space<vmem>>, vector<6x1xf32>
      tpu.vector_store %arg5[%c0_21, %c0_22], %65 {strides = array<i32>} : memref<6x1xf32, #tpu.memory_space<vmem>>, vector<6x1xf32>,
      %cst_23 = arith.constant 0.000000e+00 : f32
      %67 = vector.broadcast %cst_23 : f32 to vector<6x1xf32>
      %c0_24 = arith.constant 0 : index
      %c0_25 = arith.constant 0 : index
      %68 = vector.load %arg6[%c0_24, %c0_25] : memref<6x1xf32, #tpu.memory_space<vmem>>, vector<6x1xf32>
      tpu.vector_store %arg6[%c0_24, %c0_25], %67 {strides = array<i32>} : memref<6x1xf32, #tpu.memory_space<vmem>>, vector<6x1xf32>,
    } else {
    }
    %c0 = arith.constant 0 : index
    %c0_1 = arith.constant 0 : index
    %3 = vector.load %arg3[%c0, %c0_1] : memref<5x128xf32, #tpu.memory_space<vmem>>, vector<5x128xf32>
    %c0_2 = arith.constant 0 : index
    %c0_3 = arith.constant 0 : index
    %4 = vector.load %arg1[%c0_2, %c0_3] : memref<6x5xf32, #tpu.memory_space<vmem>>, vector<6x5xf32>
    %c0_4 = arith.constant 0 : index
    %c0_5 = arith.constant 0 : index
    %5 = vector.load %arg2[%c0_4, %c0_5] : memref<6x1xf32, #tpu.memory_space<vmem>>, vector<6x1xf32>
    %6 = vector.extract_strided_slice %4 {offsets = [0, 0], sizes = [6, 1], strides = [1, 1]} : vector<6x5xf32> to vector<6x1xf32>
    %7 = vector.extract_strided_slice %3 {offsets = [0, 0], sizes = [1, 128], strides = [1, 1]} : vector<5x128xf32> to vector<1x128xf32>
    %8 = vector.broadcast %6 : vector<6x1xf32> to vector<6x128xf32>
    %9 = vector.broadcast %7 : vector<1x128xf32> to vector<6x128xf32>
    %10 = arith.mulf %8, %9 : vector<6x128xf32>
    %11 = vector.broadcast %5 : vector<6x1xf32> to vector<6x128xf32>
    %12 = arith.addf %11, %10 : vector<6x128xf32>
    %13 = vector.extract_strided_slice %4 {offsets = [0, 1], sizes = [6, 1], strides = [1, 1]} : vector<6x5xf32> to vector<6x1xf32>
    %14 = vector.extract_strided_slice %3 {offsets = [1, 0], sizes = [1, 128], strides = [1, 1]} : vector<5x128xf32> to vector<1x128xf32>
    %15 = vector.broadcast %13 : vector<6x1xf32> to vector<6x128xf32>
    %16 = vector.broadcast %14 : vector<1x128xf32> to vector<6x128xf32>
    %17 = arith.mulf %15, %16 : vector<6x128xf32>
    %18 = arith.addf %12, %17 : vector<6x128xf32>
    %19 = vector.extract_strided_slice %4 {offsets = [0, 2], sizes = [6, 1], strides = [1, 1]} : vector<6x5xf32> to vector<6x1xf32>
    %20 = vector.extract_strided_slice %3 {offsets = [2, 0], sizes = [1, 128], strides = [1, 1]} : vector<5x128xf32> to vector<1x128xf32>
    %21 = vector.broadcast %19 : vector<6x1xf32> to vector<6x128xf32>
    %22 = vector.broadcast %20 : vector<1x128xf32> to vector<6x128xf32>
    %23 = arith.mulf %21, %22 : vector<6x128xf32>
    %24 = arith.addf %18, %23 : vector<6x128xf32>
    %25 = vector.extract_strided_slice %4 {offsets = [0, 3], sizes = [6, 1], strides = [1, 1]} : vector<6x5xf32> to vector<6x1xf32>
    %26 = vector.extract_strided_slice %3 {offsets = [3, 0], sizes = [1, 128], strides = [1, 1]} : vector<5x128xf32> to vector<1x128xf32>
    %27 = vector.broadcast %25 : vector<6x1xf32> to vector<6x128xf32>
    %28 = vector.broadcast %26 : vector<1x128xf32> to vector<6x128xf32>
    %29 = arith.mulf %27, %28 : vector<6x128xf32>
    %30 = arith.addf %24, %29 : vector<6x128xf32>
    %31 = vector.extract_strided_slice %4 {offsets = [0, 4], sizes = [6, 1], strides = [1, 1]} : vector<6x5xf32> to vector<6x1xf32>
    %32 = vector.extract_strided_slice %3 {offsets = [4, 0], sizes = [1, 128], strides = [1, 1]} : vector<5x128xf32> to vector<1x128xf32>
    %33 = vector.broadcast %31 : vector<6x1xf32> to vector<6x128xf32>
    %34 = vector.broadcast %32 : vector<1x128xf32> to vector<6x128xf32>
    %35 = arith.mulf %33, %34 : vector<6x128xf32>
    %36 = arith.addf %30, %35 : vector<6x128xf32>
    %c128_i32 = arith.constant 128 : i32
    %37 = arith.muli %arg0, %c128_i32 : i32
    %38 = tpu.iota {dimensions = array<i32: 1>} : vector<6x128xi32>
    %39 = vector.broadcast %37 : i32 to vector<6x128xi32>
    %40 = arith.addi %39, %38 : vector<6x128xi32>
    %c8_i32 = arith.constant 8 : i32
    %41 = vector.broadcast %c8_i32 : i32 to vector<6x128xi32>
    %42 = arith.cmpi slt, %40, %41 : vector<6x128xi32>
    %cst = arith.constant 0xFF800000 : f32
    %43 = vector.broadcast %cst : f32 to vector<6x128xf32>
    %44 = arith.select %42, %36, %43 : vector<6x128xi1>, vector<6x128xf32>
    %cst_6 = arith.constant dense<0xFF800000> : vector<6xf32>
    %45 = vector.multi_reduction <maximumf>, %44, %cst_6 [1] : vector<6x128xf32> to vector<6xf32>
    %46 = vector.shape_cast %45 : vector<6xf32> to vector<6x1xf32>
    %c0_7 = arith.constant 0 : index
    %c0_8 = arith.constant 0 : index
    %47 = vector.load %arg5[%c0_7, %c0_8] : memref<6x1xf32, #tpu.memory_space<vmem>>, vector<6x1xf32>
    %48 = arith.maximumf %47, %46 : vector<6x1xf32>
    %c0_9 = arith.constant 0 : index
    %c0_10 = arith.constant 0 : index
    %49 = vector.load %arg6[%c0_9, %c0_10] : memref<6x1xf32, #tpu.memory_space<vmem>>, vector<6x1xf32>
    %c0_11 = arith.constant 0 : index
    %c0_12 = arith.constant 0 : index
    %50 = vector.load %arg5[%c0_11, %c0_12] : memref<6x1xf32, #tpu.memory_space<vmem>>, vector<6x1xf32>
    %51 = arith.subf %50, %48 : vector<6x1xf32>
    %52 = math.exp %51 : vector<6x1xf32>
    %53 = arith.mulf %49, %52 : vector<6x1xf32>
    %54 = vector.broadcast %48 : vector<6x1xf32> to vector<6x128xf32>
    %55 = arith.subf %44, %54 : vector<6x128xf32>
    %56 = math.exp %55 : vector<6x128xf32>
    %cst_13 = arith.constant dense<0.000000e+00> : vector<6xf32>
    %57 = vector.multi_reduction <add>, %56, %cst_13 [1] : vector<6x128xf32> to vector<6xf32>
    %58 = vector.shape_cast %57 : vector<6xf32> to vector<6x1xf32>
    %59 = arith.addf %53, %58 : vector<6x1xf32>
    %c0_14 = arith.constant 0 : index
    %c0_15 = arith.constant 0 : index
    %60 = vector.load %arg6[%c0_14, %c0_15] : memref<6x1xf32, #tpu.memory_space<vmem>>, vector<6x1xf32>
    tpu.vector_store %arg6[%c0_14, %c0_15], %59 {strides = array<i32>} : memref<6x1xf32, #tpu.memory_space<vmem>>, vector<6x1xf32>,
    %c0_16 = arith.constant 0 : index
    %c0_17 = arith.constant 0 : index
    %61 = vector.load %arg5[%c0_16, %c0_17] : memref<6x1xf32, #tpu.memory_space<vmem>>, vector<6x1xf32>
    tpu.vector_store %arg5[%c0_16, %c0_17], %48 {strides = array<i32>} : memref<6x1xf32, #tpu.memory_space<vmem>>, vector<6x1xf32>,
    %c0_i32_18 = arith.constant 0 : i32
    %62 = arith.cmpi eq, %arg0, %c0_i32_18 : i32
    %63 = arith.extui %62 : i1 to i32
    %c0_i32_19 = arith.constant 0 : i32
    %64 = arith.cmpi ne, %63, %c0_i32_19 : i32
    scf.if %64 {
      %c0_20 = arith.constant 0 : index
      %c0_21 = arith.constant 0 : index
      %65 = vector.load %arg5[%c0_20, %c0_21] : memref<6x1xf32, #tpu.memory_space<vmem>>, vector<6x1xf32>
      %c0_22 = arith.constant 0 : index
      %c0_23 = arith.constant 0 : index
      %66 = vector.load %arg6[%c0_22, %c0_23] : memref<6x1xf32, #tpu.memory_space<vmem>>, vector<6x1xf32>
      %67 = math.log %66 : vector<6x1xf32>
      %68 = arith.addf %65, %67 : vector<6x1xf32>
      %c0_24 = arith.constant 0 : index
      %c0_25 = arith.constant 0 : index
      %69 = vector.load %arg4[%c0_24, %c0_25] : memref<6x1xf32, #tpu.memory_space<vmem>>, vector<6x1xf32>
      tpu.vector_store %arg4[%c0_24, %c0_25], %68 {strides = array<i32>} : memref<6x1xf32, #tpu.memory_space<vmem>>, vector<6x1xf32>,
    } else {
    }
    return
  }
  func.func @transform_0(%arg0: i32) -> (i32, i32) {
    %c0_i32 = arith.constant 0 : i32
    %c0_i32_0 = arith.constant 0 : i32
    %c0_i32_1 = arith.constant 0 : i32
    return %c0_i32, %c0_i32_0 : i32, i32
  }
  func.func @transform_1(%arg0: i32) -> (i32, i32) {
    %c0_i32 = arith.constant 0 : i32
    %c0_i32_0 = arith.constant 0 : i32
    %c0_i32_1 = arith.constant 0 : i32
    return %c0_i32, %c0_i32_0 : i32, i32
  }
  func.func @transform_2(%arg0: i32) -> (i32, i32) {
    %c0_i32 = arith.constant 0 : i32
    %c0_i32_0 = arith.constant 0 : i32
    return %c0_i32, %arg0 : i32, i32
  }
  func.func @transform_3(%arg0: i32) -> (i32, i32) {
    %c0_i32 = arith.constant 0 : i32
    %c0_i32_0 = arith.constant 0 : i32
    %c0_i32_1 = arith.constant 0 : i32
    return %c0_i32, %c0_i32_0 : i32, i32
  }
}

module attributes {stable_mosaic.version = 11 : i64} {
  func.func @_normalize_kernel(%arg0: i32, %arg1: memref<6x5xf32, #tpu.memory_space<vmem>>, %arg2: memref<6x1xf32, #tpu.memory_space<vmem>>, %arg3: memref<6x1xf32, #tpu.memory_space<vmem>>, %arg4: memref<5x128xf32, #tpu.memory_space<vmem>>, %arg5: memref<6x128xf32, #tpu.memory_space<vmem>>) attributes {dimension_semantics = [#tpu.dimension_semantics<parallel>], iteration_bounds = array<i64: 1>, scalar_prefetch = 0 : i64, scratch_operands = 0 : i64, tpu.core_type = #tpu.core_type<tc>, window_params = [{pipeline_mode = #tpu.pipeline_mode<synchronous>, transform_indices = @transform_0, window_bounds = array<i64: 6, 5>}, {pipeline_mode = #tpu.pipeline_mode<synchronous>, transform_indices = @transform_1, window_bounds = array<i64: 6, 1>}, {pipeline_mode = #tpu.pipeline_mode<synchronous>, transform_indices = @transform_2, window_bounds = array<i64: 6, 1>}, {transform_indices = @transform_3, window_bounds = array<i64: 5, 128>}, {transform_indices = @transform_4, window_bounds = array<i64: 6, 128>}]} {
    %c0 = arith.constant 0 : index
    %c0_0 = arith.constant 0 : index
    %0 = vector.load %arg4[%c0, %c0_0] : memref<5x128xf32, #tpu.memory_space<vmem>>, vector<5x128xf32>
    %c0_1 = arith.constant 0 : index
    %c0_2 = arith.constant 0 : index
    %1 = vector.load %arg1[%c0_1, %c0_2] : memref<6x5xf32, #tpu.memory_space<vmem>>, vector<6x5xf32>
    %c0_3 = arith.constant 0 : index
    %c0_4 = arith.constant 0 : index
    %2 = vector.load %arg2[%c0_3, %c0_4] : memref<6x1xf32, #tpu.memory_space<vmem>>, vector<6x1xf32>
    %3 = vector.extract_strided_slice %1 {offsets = [0, 0], sizes = [6, 1], strides = [1, 1]} : vector<6x5xf32> to vector<6x1xf32>
    %4 = vector.extract_strided_slice %0 {offsets = [0, 0], sizes = [1, 128], strides = [1, 1]} : vector<5x128xf32> to vector<1x128xf32>
    %5 = vector.broadcast %3 : vector<6x1xf32> to vector<6x128xf32>
    %6 = vector.broadcast %4 : vector<1x128xf32> to vector<6x128xf32>
    %7 = arith.mulf %5, %6 : vector<6x128xf32>
    %8 = vector.broadcast %2 : vector<6x1xf32> to vector<6x128xf32>
    %9 = arith.addf %8, %7 : vector<6x128xf32>
    %10 = vector.extract_strided_slice %1 {offsets = [0, 1], sizes = [6, 1], strides = [1, 1]} : vector<6x5xf32> to vector<6x1xf32>
    %11 = vector.extract_strided_slice %0 {offsets = [1, 0], sizes = [1, 128], strides = [1, 1]} : vector<5x128xf32> to vector<1x128xf32>
    %12 = vector.broadcast %10 : vector<6x1xf32> to vector<6x128xf32>
    %13 = vector.broadcast %11 : vector<1x128xf32> to vector<6x128xf32>
    %14 = arith.mulf %12, %13 : vector<6x128xf32>
    %15 = arith.addf %9, %14 : vector<6x128xf32>
    %16 = vector.extract_strided_slice %1 {offsets = [0, 2], sizes = [6, 1], strides = [1, 1]} : vector<6x5xf32> to vector<6x1xf32>
    %17 = vector.extract_strided_slice %0 {offsets = [2, 0], sizes = [1, 128], strides = [1, 1]} : vector<5x128xf32> to vector<1x128xf32>
    %18 = vector.broadcast %16 : vector<6x1xf32> to vector<6x128xf32>
    %19 = vector.broadcast %17 : vector<1x128xf32> to vector<6x128xf32>
    %20 = arith.mulf %18, %19 : vector<6x128xf32>
    %21 = arith.addf %15, %20 : vector<6x128xf32>
    %22 = vector.extract_strided_slice %1 {offsets = [0, 3], sizes = [6, 1], strides = [1, 1]} : vector<6x5xf32> to vector<6x1xf32>
    %23 = vector.extract_strided_slice %0 {offsets = [3, 0], sizes = [1, 128], strides = [1, 1]} : vector<5x128xf32> to vector<1x128xf32>
    %24 = vector.broadcast %22 : vector<6x1xf32> to vector<6x128xf32>
    %25 = vector.broadcast %23 : vector<1x128xf32> to vector<6x128xf32>
    %26 = arith.mulf %24, %25 : vector<6x128xf32>
    %27 = arith.addf %21, %26 : vector<6x128xf32>
    %28 = vector.extract_strided_slice %1 {offsets = [0, 4], sizes = [6, 1], strides = [1, 1]} : vector<6x5xf32> to vector<6x1xf32>
    %29 = vector.extract_strided_slice %0 {offsets = [4, 0], sizes = [1, 128], strides = [1, 1]} : vector<5x128xf32> to vector<1x128xf32>
    %30 = vector.broadcast %28 : vector<6x1xf32> to vector<6x128xf32>
    %31 = vector.broadcast %29 : vector<1x128xf32> to vector<6x128xf32>
    %32 = arith.mulf %30, %31 : vector<6x128xf32>
    %33 = arith.addf %27, %32 : vector<6x128xf32>
    %c0_5 = arith.constant 0 : index
    %c0_6 = arith.constant 0 : index
    %34 = vector.load %arg3[%c0_5, %c0_6] : memref<6x1xf32, #tpu.memory_space<vmem>>, vector<6x1xf32>
    %35 = vector.broadcast %34 : vector<6x1xf32> to vector<6x128xf32>
    %36 = arith.subf %33, %35 : vector<6x128xf32>
    %c0_7 = arith.constant 0 : index
    %c0_8 = arith.constant 0 : index
    %37 = vector.load %arg5[%c0_7, %c0_8] : memref<6x128xf32, #tpu.memory_space<vmem>>, vector<6x128xf32>
    tpu.vector_store %arg5[%c0_7, %c0_8], %36 {strides = array<i32>} : memref<6x128xf32, #tpu.memory_space<vmem>>, vector<6x128xf32>,
    return
  }
  func.func @transform_0(%arg0: i32) -> (i32, i32) {
    %c0_i32 = arith.constant 0 : i32
    %c0_i32_0 = arith.constant 0 : i32
    %c0_i32_1 = arith.constant 0 : i32
    return %c0_i32, %c0_i32_0 : i32, i32
  }
  func.func @transform_1(%arg0: i32) -> (i32, i32) {
    %c0_i32 = arith.constant 0 : i32
    %c0_i32_0 = arith.constant 0 : i32
    %c0_i32_1 = arith.constant 0 : i32
    return %c0_i32, %c0_i32_0 : i32, i32
  }
  func.func @transform_2(%arg0: i32) -> (i32, i32) {
    %c0_i32 = arith.constant 0 : i32
    %c0_i32_0 = arith.constant 0 : i32
    %c0_i32_1 = arith.constant 0 : i32
    return %c0_i32, %c0_i32_0 : i32, i32
  }
  func.func @transform_3(%arg0: i32) -> (i32, i32) {
    %c0_i32 = arith.constant 0 : i32
    %c0_i32_0 = arith.constant 0 : i32
    return %c0_i32, %arg0 : i32, i32
  }
  func.func @transform_4(%arg0: i32) -> (i32, i32) {
    %c0_i32 = arith.constant 0 : i32
    %c0_i32_0 = arith.constant 0 : i32
    return %c0_i32, %arg0 : i32, i32
  }
}

</mosaic_0001>

<bundles_post_ra>
// kernel: wm_private_forward.3
= control target key start
LH: loop header
LB: loop body
LE: loop exit
PB: predicated region body
PF: predicated region fallthrough
CT: control target
= control target key end

     0   :  { %v83_v0 = vmov 0   ;;  %v84_v1 = vmov 1   ;;  %v85_v3 = vmov 3   ;;  %v86_v5 = vmov 2   ;;  %s128_s0 = inlined_call_operand.vmem [shape: f32[6,5], index: 0, kind: input, shape index: {}]   ;;  %s129_s1 = inlined_call_operand.vmem [shape: f32[6,1], index: 1, kind: input, shape index: {}]   ;;  %s130_s2 = inlined_call_operand.vmem [shape: f32[6,1], index: 2, kind: input, shape index: {}]   ;;  %s131_s3 = inlined_call_operand.vmem [shape: f32[5,128], index: 3, kind: input, shape index: {}]   ;;  %s132_s4 = inlined_call_operand.vmem [shape: f32[6,128], index: 4, kind: output, shape index: {}]  }
   0x1   :  { %78 = vset.pattern.permute.xlu0 %v83_v0  ;;  %79 = vset.pattern.permute.xlu1 %v84_v1  ;;  %v18_v2 = vld [vmem:[%s128_s0] sm:$0x3f]  ;;  %v87_v6 = vmov 4  }
   0x2   :  { %22 = vperm.xlu0 %78, %v18_v2   ;;  %34 = vperm.xlu1 %79, %v18_v2   ;;  %v19_v4 = vld [vmem:[%s129_s1] sm:$0x3f] }
   0x3   :  { %81 = vset.pattern.permute.xlu2 %v85_v3  ;;  %v61_v7 = vld [vmem:[%s130_s2] sm:$0x3f] }
   0x4   :  { %48 = vperm.xlu2 %81, %v18_v2   ;;  %v17_v9 = vld [vmem:[%s131_s3] sm:$0x1f] }
   0x5   :  { %v25_v12 = vperm.slane %v17_v9, 0  ;;  %v37_v13 = vperm.slane %v17_v9, 1  ;;  %v44_v14 = vperm.slane %v17_v9, 2  ;;  %v51_v18 = vperm.slane %v17_v9, 3 }
   0x6   :  { %v58_v21 = vperm.slane %v17_v9, 4 }
   0xa   :  { %29 = vperm.xlu0 %78, %v19_v4   ;;  %80 = vset.pattern.permute.xlu1 %v86_v5 }
   0xb   :  { %41 = vperm.xlu1 %80, %v18_v2  }
   0xc   :  { %82 = vset.pattern.permute.xlu2 %v87_v6 }
   0xd   :  { %55 = vperm.xlu2 %82, %v18_v2  }
  0x12   :  { %64 = vperm.xlu0 %78, %v61_v7  }
  0x5e   :  { %v49_v8 = vpop.permute.xlu2 %48 }
  0x5f   :  { %v52_v25 = vmul.f32 %v51_v18, %v49_v8 }
  0x67   :  { %v56_v23 = vpop.permute.xlu2 %55 }
  0x68   :  { %v59_v27 = vmul.f32 %v58_v21, %v56_v23 }
  0x74   :  { %v23_v10 = vpop.permute.xlu0 %22  ;;  %v35_v11 = vpop.permute.xlu1 %34 }
  0x75   :  { %v26_v15 = vmul.f32 %v25_v12, %v23_v10  ;;  %v38_v17 = vmul.f32 %v37_v13, %v35_v11 }
  0x7c   :  { %v30_v16 = vpop.permute.xlu0 %29 }
  0x7d   :  { %v32_v19 = vadd.f32 %v30_v16, %v26_v15  ;;  %v42_v20 = vpop.permute.xlu1 %41 }
  0x7e   :  { %v45_v22 = vmul.f32 %v44_v14, %v42_v20 }
  0x7f   :  { %v39_v24 = vadd.f32 %v38_v17, %v32_v19 }
  0x81   :  { %v46_v26 = vadd.f32 %v45_v22, %v39_v24 }
  0x83   :  { %v53_v28 = vadd.f32 %v52_v25, %v46_v26 }
  0x84   :  { %v65_v30 = vpop.permute.xlu0 %64 }
  0x85   :  { %v60_v29 = vadd.f32 %v59_v27, %v53_v28 }
  0x87   :  { %v67_v31 = vsub.f32 %v60_v29, %v65_v30 }
  0x89   :  { %68 = vst [vmem:[%s132_s4] sm:$0x3f] %v67_v31 }

// kernel: wm_private_forward.2
= control target key start
LH: loop header
LB: loop body
LE: loop exit
PB: predicated region body
PF: predicated region fallthrough
CT: control target
= control target key end

     0   :  { %v130_v0 = vmov 0   ;;  %v131_v1 = vmov 1   ;;  %v132_v3 = vmov 3   ;;  %v133_v5 = vmov 2   ;;  %s176_s0 = inlined_call_operand.vmem [shape: f32[6,5], index: 0, kind: input, shape index: {}]   ;;  %s177_s1 = inlined_call_operand.vmem [shape: f32[6,1], index: 1, kind: input, shape index: {}]   ;;  %s178_s2 = inlined_call_operand.vmem [shape: f32[5,128], index: 2, kind: input, shape index: {}]   ;;  %s179_s3 = inlined_call_operand.vmem [shape: f32[6,1], index: 3, kind: output, shape index: {}]  }
   0x1   :  { %118 = vset.pattern.permute.xlu0 %v130_v0  ;;  %119 = vset.pattern.permute.xlu1 %v131_v1  ;;  %v22_v2 = vld [vmem:[%s176_s0] sm:$0x3f]  ;;  %v134_v6 = vmov 4   ;;  %vm18_vm0 = vcmask 5120   ;;  %v135_v7 = vmov -inf   ;;  %v66_v17 = vlaneseq }
   0x2   :  { %26 = vperm.xlu0 %118, %v22_v2   ;;  %38 = vperm.xlu1 %119, %v22_v2   ;;  %v23_v4 = vld [vmem:[%s177_s1] sm:$0x3f]  ;;  %19 = vst.msk [vmem:[#allocation2] sm:$0x3f] %vm18_vm0, %v135_v7  ;;  %vm72_vm2 = vcmask 1045504   ;;  %v136_v34 = vmov 0.0  }
   0x3   :  { %121 = vset.pattern.permute.xlu2 %v132_v3  ;;  %v21_v9 = vld [vmem:[%s178_s2] sm:$0x1f]  ;;  %v67_v26 = vand.u32 127, %v66_v17  ;;  %20 = vst.msk [vmem:[#allocation3] sm:$0x3f] %vm18_vm0, %v136_v34 }
   0x4   :  { %52 = vperm.xlu2 %121, %v22_v2   ;;  %v29_v12 = vperm.slane %v21_v9, 0  ;;  %v41_v13 = vperm.slane %v21_v9, 1  ;;  %v48_v14 = vperm.slane %v21_v9, 2  ;;  %v55_v19 = vperm.slane %v21_v9, 3 }
   0x5   :  { %v62_v22 = vperm.slane %v21_v9, 4  ;;  %vm70_vm1 = vcmp.lt.s32.totalorder %v67_v26, 8 }
   0x9   :  { %v76_v35 = vld [vmem:[#allocation2] sm:$0x3f] }
   0xa   :  { %33 = vperm.xlu0 %118, %v23_v4   ;;  %120 = vset.pattern.permute.xlu1 %v133_v5  ;;  %v78_v46 = vld [vmem:[#allocation3] sm:$0x3f] }
   0xb   :  { %45 = vperm.xlu1 %120, %v22_v2  }
   0xc   :  { %122 = vset.pattern.permute.xlu2 %v134_v6 }
   0xd   :  { %59 = vperm.xlu2 %122, %v22_v2  }
  0x13   :  { %123 = vset.pattern.permute.xlu1 %v130_v0 }
  0x5e   :  { %v53_v8 = vpop.permute.xlu2 %52 }
  0x5f   :  { %v56_v27 = vmul.f32 %v55_v19, %v53_v8 }
  0x67   :  { %v60_v24 = vpop.permute.xlu2 %59 }
  0x68   :  { %v63_v29 = vmul.f32 %v62_v22, %v60_v24 }
  0x74   :  { %v27_v10 = vpop.permute.xlu0 %26  ;;  %v39_v11 = vpop.permute.xlu1 %38 }
  0x75   :  { %v30_v15 = vmul.f32 %v29_v12, %v27_v10  ;;  %v42_v18 = vmul.f32 %v41_v13, %v39_v11 }
  0x7c   :  { %v34_v16 = vpop.permute.xlu0 %33 }
  0x7d   :  { %v36_v20 = vadd.f32 %v34_v16, %v30_v15  ;;  %v46_v21 = vpop.permute.xlu1 %45 }
  0x7e   :  { %v49_v23 = vmul.f32 %v48_v14, %v46_v21 }
  0x7f   :  { %v43_v25 = vadd.f32 %v42_v18, %v36_v20 }
  0x81   :  { %v50_v28 = vadd.f32 %v49_v23, %v43_v25 }
  0x83   :  { %v57_v30 = vadd.f32 %v56_v27, %v50_v28 }
  0x85   :  { %v64_v31 = vadd.f32 %v63_v29, %v57_v30 }
  0x87   :  { %v71_v32 = vsel %vm70_vm1, %v64_v31, -inf }
  0x88   :  { %v73_v33 = vsel %vm72_vm2, %v71_v32, -inf }
  0x89   :  { %74 = vmax.xlane.f32.xlu0 %v73_v33 }
  0xfc   :  { %v75_v36 = vpop.xlane.xlu0 %74 }
  0xfd   :  { %v77_v37 = vmax.f32 %v76_v35, %v75_v36 }
  0xff   :  { %v79_v38 = vsub.f32 %v76_v35, %v77_v37  ;;  %97 = vst.msk [vmem:[#allocation2] sm:$0x3f] %vm18_vm0, %v77_v37  ;;  %85 = vperm.xlu1 %123, %v77_v37  }
 0x101   :  { %v80_v44 = vmul.f32 1.442695, %v79_v38 }
 0x106   :  { %v101_v53 = vld [vmem:[#allocation2] sm:$0x3f] }
 0x171   :  { %v86_v39 = vpop.permute.xlu1 %85 }
 0x172   :  { %v88_v40 = vsub.f32 %v71_v32, %v86_v39 }
 0x174   :  { %v89_v41 = vmul.f32 1.442695, %v88_v40 }
 0x176   :  { %124 = vpow2.f32 %v89_v41 }
 0x177   :  { %126 = vpow2.f32 %v80_v44 }
 0x17c   :  { %v125_v42 = vpop.eup %124 }
 0x17d   :  { %v91_v43 = vsel %vm72_vm2, %v125_v42, 0.0  ;;  %v127_v45 = vpop.eup %126 }
 0x17e   :  { %92 = vadd.xlane.f32.xlu2 %v91_v43  ;;  %v82_v47 = vmul.f32 %v127_v45, %v78_v46 }
 0x1f1   :  { %v93_v48 = vpop.xlane.xlu2 %92 }
 0x1f2   :  { %v94_v49 = vadd.f32 %v93_v48, %v82_v47 }
 0x1f4   :  { %96 = vst.msk [vmem:[#allocation3] sm:$0x3f] %vm18_vm0, %v94_v49 }
 0x1fb   :  { %v102_v50 = vld [vmem:[#allocation3] sm:$0x3f] }
 0x1fc   :  { %128 = vlog2.f32 %v102_v50 }
 0x202   :  { %v129_v51 = vpop.eup %128 }
 0x203   :  { %v104_v52 = vmul.f32 0.6931472, %v129_v51 }
 0x205   :  { %v105_v54 = vadd.f32 %v104_v52, %v101_v53 }
 0x207   :  { %106 = vst.msk [vmem:[%s179_s3] sm:$0x3f] %vm18_vm0, %v105_v54 }

</bundles_post_ra>
